<compile_context>
chip_gen: v6e
topology: v6e:2x2x1
jax: 0.10.0
libtpu: 0.0.40
codegen_flags: <defaults>
</compile_context>

<pallas_src>
import functools

import jax
import jax.numpy as jnp
from jax import lax
from jax.experimental import pallas as pl
from jax.experimental.pallas import tpu as pltpu


def _int_pow(x, n):
    """x**n for static positive int n via trace-time exponentiation-by-squaring
    (pure VPU multiplies, keeps the EUP slot free)."""
    acc = None
    base = x
    while n > 0:
        if n & 1:
            acc = base if acc is None else acc * base
        n >>= 1
        if n:
            base = base * base
    return acc


def _pow_p(xc, p):
    if float(p).is_integer() and p >= 1.0:
        return _int_pow(xc, int(p))
    return xc ** p


def _gem_kernel(x_ref, o_ref, acc_ref, *, p, eps, inv_hw, total_cols,
                block_cols, needs_mask):
    """One (row_tile, spatial_chunk) grid step of GeM.

    x_ref:   (block_rows, block_cols)  input tile (native input dtype)
    o_ref:   (block_rows, 1)           pooled output (written on last chunk)
    acc_ref: (block_rows, 1) f32       running sum of clamp(x, eps) ** p
    """
    k = pl.program_id(1)
    nk = pl.num_programs(1)

    @pl.when(k == 0)
    def _():
        acc_ref[...] = jnp.zeros_like(acc_ref)

    x = x_ref[...].astype(jnp.float32)
    xc = jnp.maximum(x, eps)                       # clamp(min=eps)
    xp = _pow_p(xc, p)                             # x ** p (VPU for integer p)

    if needs_mask:
        # Ragged last spatial chunk only: all earlier chunks accumulate
        # unmasked (no per-chunk iota/compare/select VALU overhead).
        @pl.when(k < nk - 1)
        def _():
            acc_ref[...] += jnp.sum(xp, axis=-1, keepdims=True)

        @pl.when(k == nk - 1)
        def _():
            col = lax.broadcasted_iota(jnp.int32, xp.shape, 1) + k * block_cols
            masked = jnp.where(col < total_cols, xp, 0.0)
            acc_ref[...] += jnp.sum(masked, axis=-1, keepdims=True)
    else:
        acc_ref[...] += jnp.sum(xp, axis=-1, keepdims=True)

    @pl.when(k == nk - 1)
    def _():
        m = acc_ref[...] * inv_hw                  # mean folded into finalize
        o_ref[...] = (m ** (1.0 / p)).astype(o_ref.dtype)  # cheap: N*C values


def _sublane_multiple(dtype):
    """Sublane rounding for packed dtypes: 8 (f32), 16 (bf16), 32 (int8)."""
    bits = jnp.dtype(dtype).itemsize * 8
    return max(8, 256 // bits)


def _round_up(x, m):
    return ((x + m - 1) // m) * m


def _vmem_capacity_bytes():
    try:
        return int(pltpu.get_tpu_info().vmem_capacity_bytes)
    except Exception:
        return 64 * 1024 * 1024  # conservative fallback (v7x per-TC VMEM)


def _choose_tiles(rows, cols, dtype):
    """Byte-budgeted (block_rows, block_cols, n_row_tiles, n_chunks, mask, vmem_limit)."""
    itemsize = jnp.dtype(dtype).itemsize
    sub = _sublane_multiple(dtype)
    vmem_cap = _vmem_capacity_bytes()

    # Generation-aware budget: the pipeline double-buffers the input block, so
    # keep 2 * block + scratch well inside the VMEM limit.
    if vmem_cap >= 96 * 1024 * 1024:          # v5e / v6e: 128 MiB physical VMEM
        block_budget = 12 * 1024 * 1024
        vmem_limit = 64 * 1024 * 1024
    else:                                     # v7x: 64 MiB per TensorCore
        block_budget = 6 * 1024 * 1024
        vmem_limit = 40 * 1024 * 1024
    budget_elems = block_budget // itemsize

    # --- spatial (lane) axis ---
    # Keep the whole reduction in one block when it fits the budget with at
    # least a couple of sublane groups of rows; otherwise chunk it, preferring
    # a multiple-of-128 divisor of cols so no ragged mask is ever needed.
    max_cols_single = max(128, budget_elems // (2 * sub))
    if cols <= max_cols_single:
        bc, nk = cols, 1                      # full dim -> layout-legal
    else:
        cap = (max_cols_single // 128) * 128
        bc = 0
        for cand in range(cap, 0, -128):
            if cols % cand == 0:
                bc = cand
                break
        if bc == 0:
            bc = cap                          # ragged; masked only on last chunk
        nk = pl.cdiv(cols, bc)
    needs_mask = (cols % bc) != 0

    # --- row (sublane) axis ---
    target_rows = max(sub, ((budget_elems // max(bc, 1)) // sub) * sub)
    if rows <= sub:
        br, nr = rows, 1                      # full dim -> layout-legal
    else:
        # Keep >= 2 row tiles so the "parallel" axis shards across both
        # TensorCores on v7x; neutral on single-TC v5e/v6e.
        half_rows = _round_up(pl.cdiv(rows, 2), sub)
        br = max(sub, min(target_rows, half_rows))
        nr = pl.cdiv(rows, br)
    return br, bc, nr, nk, needs_mask, vmem_limit


def gem_pallas(x, p=3.0, eps=1e-6):
    """GeM pooling. x: (N, C, H, W) -> (N, C, 1, 1)."""
    # NOTE: p is baked in statically (module default p_trainable=False).
    # TODO(synk): a trainable / traced p would need to be passed as an SMEM
    # scalar and use the general exp/log pow path.
    # TODO(synk): for very small H*W (< 128 lanes, e.g. 7x7 heads) the lane
    # axis is under-filled; packing several (n,c) rows into the lane dimension
    # with a segmented reduce would fill vregs, at the cost of extra plumbing.
    N, C, H, W = x.shape
    rows, cols = N * C, H * W
    x_flat = x.reshape(rows, cols)            # contiguous reshape: free

    br, bc, nr, nk, needs_mask, vmem_limit = _choose_tiles(rows, cols, x.dtype)

    kernel = functools.partial(
        _gem_kernel, p=float(p), eps=float(eps), inv_hw=1.0 / float(cols),
        total_cols=cols, block_cols=bc, needs_mask=needs_mask)

    out = pl.pallas_call(
        kernel,
        out_shape=jax.ShapeDtypeStruct((rows, 1), x.dtype),
        grid_spec=pltpu.PrefetchScalarGridSpec(
            num_scalar_prefetch=0,
            grid=(nr, nk),
            in_specs=[pl.BlockSpec((br, bc), lambda i, k: (i, k))],
            out_specs=pl.BlockSpec((br, 1), lambda i, k: (i, 0)),
            scratch_shapes=[pltpu.VMEM((br, 1), jnp.float32)],
        ),
        compiler_params=pltpu.CompilerParams(
            dimension_semantics=("parallel", "arbitrary"),
            vmem_limit_bytes=vmem_limit,
        ),
    )(x_flat)

    return out.reshape(N, C, 1, 1)


def gem_reference(x, p=3.0, eps=1e-6):
    # Pure-JAX reference matching the PyTorch semantics.
    xc = jnp.maximum(x, eps) ** p
    m = jnp.mean(xc, axis=(-2, -1), keepdims=True)
    return m ** (1.0 / p)


if __name__ == "__main__":
    key = jax.random.PRNGKey(0)
    N, C, H, W = 2, 4, 16, 16
    x = jax.random.normal(key, (N, C, H, W), dtype=jnp.float32)

    # GeM module defaults: p=3 (non-trainable), eps=1e-6
    out = gem_pallas(x, p=3.0, eps=1e-6)
    out = jax.block_until_ready(out)

    ref = gem_reference(x, p=3.0, eps=1e-6)
    assert out.shape == (N, C, 1, 1), out.shape
    assert jnp.allclose(out, ref, atol=1e-5, rtol=1e-5), (
        f"max err {jnp.max(jnp.abs(out - ref))}")

    print("KERNEL_OK")
</pallas_src>

<mosaic_0001>
module attributes {stable_mosaic.version = 11 : i64} {
  func.func @_gem_kernel(%arg0: i32, %arg1: i32, %arg2: memref<8x256xf32, #tpu.memory_space<vmem>>, %arg3: memref<8x1xf32, #tpu.memory_space<vmem>>, %arg4: memref<8x1xf32, #tpu.memory_space<vmem>>) attributes {dimension_semantics = [#tpu.dimension_semantics<parallel>, #tpu.dimension_semantics<arbitrary>], iteration_bounds = array<i64: 1, 1>, scalar_prefetch = 0 : i64, scratch_operands = 1 : i64, tpu.core_type = #tpu.core_type<tc>, window_params = [{transform_indices = @transform_0, window_bounds = array<i64: 8, 256>}, {transform_indices = @transform_1, window_bounds = array<i64: 8, 1>}]} {
    %c0_i32 = arith.constant 0 : i32
    %0 = arith.cmpi eq, %arg1, %c0_i32 : i32
    %1 = arith.extui %0 : i1 to i32
    %c0_i32_0 = arith.constant 0 : i32
    %2 = arith.cmpi ne, %1, %c0_i32_0 : i32
    scf.if %2 {
      %cst_9 = arith.constant 0.000000e+00 : f32
      %16 = vector.broadcast %cst_9 : f32 to vector<8x1xf32>
      %c0_10 = arith.constant 0 : index
      %c0_11 = arith.constant 0 : index
      %17 = vector.load %arg4[%c0_10, %c0_11] : memref<8x1xf32, #tpu.memory_space<vmem>>, vector<8x1xf32>
      tpu.vector_store %arg4[%c0_10, %c0_11], %16 {strides = array<i32>} : memref<8x1xf32, #tpu.memory_space<vmem>>, vector<8x1xf32>,
    } else {
    }
    %c0 = arith.constant 0 : index
    %c0_1 = arith.constant 0 : index
    %3 = vector.load %arg2[%c0, %c0_1] : memref<8x256xf32, #tpu.memory_space<vmem>>, vector<8x256xf32>
    %cst = arith.constant 9.99999997E-7 : f32
    %4 = vector.broadcast %cst : f32 to vector<8x256xf32>
    %5 = arith.maximumf %3, %4 : vector<8x256xf32>
    %6 = arith.mulf %5, %5 : vector<8x256xf32>
    %7 = arith.mulf %5, %6 : vector<8x256xf32>
    %c0_2 = arith.constant 0 : index
    %c0_3 = arith.constant 0 : index
    %8 = vector.load %arg4[%c0_2, %c0_3] : memref<8x1xf32, #tpu.memory_space<vmem>>, vector<8x1xf32>
    %cst_4 = arith.constant dense<0.000000e+00> : vector<8xf32>
    %9 = vector.multi_reduction <add>, %7, %cst_4 [1] : vector<8x256xf32> to vector<8xf32>
    %10 = vector.shape_cast %9 : vector<8xf32> to vector<8x1xf32>
    %11 = arith.addf %8, %10 : vector<8x1xf32>
    %c0_5 = arith.constant 0 : index
    %c0_6 = arith.constant 0 : index
    %12 = vector.load %arg4[%c0_5, %c0_6] : memref<8x1xf32, #tpu.memory_space<vmem>>, vector<8x1xf32>
    tpu.vector_store %arg4[%c0_5, %c0_6], %11 {strides = array<i32>} : memref<8x1xf32, #tpu.memory_space<vmem>>, vector<8x1xf32>,
    %c0_i32_7 = arith.constant 0 : i32
    %13 = arith.cmpi eq, %arg1, %c0_i32_7 : i32
    %14 = arith.extui %13 : i1 to i32
    %c0_i32_8 = arith.constant 0 : i32
    %15 = arith.cmpi ne, %14, %c0_i32_8 : i32
    scf.if %15 {
      %c0_9 = arith.constant 0 : index
      %c0_10 = arith.constant 0 : index
      %16 = vector.load %arg4[%c0_9, %c0_10] : memref<8x1xf32, #tpu.memory_space<vmem>>, vector<8x1xf32>
      %cst_11 = arith.constant 3.906250e-03 : f32
      %17 = vector.broadcast %cst_11 : f32 to vector<8x1xf32>
      %18 = arith.mulf %16, %17 : vector<8x1xf32>
      %cst_12 = arith.constant 0.333333343 : f32
      %19 = vector.broadcast %cst_12 : f32 to vector<8x1xf32>
      %20 = math.powf %18, %19 : vector<8x1xf32>
      %c0_13 = arith.constant 0 : index
      %c0_14 = arith.constant 0 : index
      %21 = vector.load %arg3[%c0_13, %c0_14] : memref<8x1xf32, #tpu.memory_space<vmem>>, vector<8x1xf32>
      tpu.vector_store %arg3[%c0_13, %c0_14], %20 {strides = array<i32>} : memref<8x1xf32, #tpu.memory_space<vmem>>, vector<8x1xf32>,
    } else {
    }
    return
  }
  func.func @transform_0(%arg0: i32, %arg1: i32) -> (i32, i32) {
    %c0_i32 = arith.constant 0 : i32
    return %arg0, %arg1 : i32, i32
  }
  func.func @transform_1(%arg0: i32, %arg1: i32) -> (i32, i32) {
    %c0_i32 = arith.constant 0 : i32
    %c0_i32_0 = arith.constant 0 : i32
    return %arg0, %c0_i32 : i32, i32
  }
}

</mosaic_0001>

<bundles_post_ra>
// kernel: tpu_custom_call.1
= control target key start
LH: loop header
LB: loop body
LE: loop exit
PB: predicated region body
PF: predicated region fallthrough
CT: control target
= control target key end

     0   :  { %6 = vsyncpa [#allocation4], 0  ;;  %s99_s6 = smov [#allocation3]   ;;  %s120_s0 = inlined_call_operand.hbm [shape: f32[8,256], index: 0, kind: input, shape index: {}]   ;;  %s121_s1 = inlined_call_operand.vmem [shape: f32[8,1], index: 1, kind: output, shape index: {}]  }
   0x1   :  { %s13_s7 = sshll.u32 %s99_s6, 4  ;;  %s14_s7 = int_to_ptr.vmem [resolvable:$true] %s13_s7 }
   0x2   :  { %s85_s8 = scalar_lea.vmem %s14_s7, 256  ;;  %p90_p1 = scmp.lt.s32.totalorder %s14_s7, %s14_s7 }
   0x3   :  { %p86_p0 = scmp.ne.s32.totalorder %s14_s7, %s85_s8  ;;  %p91_p2 = scmp.lt.s32.totalorder %s85_s8, %s85_s8 }
   0x5   :  { %p92_p3 = por %p91_p2, %p90_p1 }
   0x7   :  { %p93_p4 = pnand %p92_p3, %p86_p0 }
   0x9   :  { %96 = shalt.err (!%p93_p4)
}
   0xa   :  { %16 = dma.hbm_to_vmem [thread:$0]  %s120_s0, 256, %s14_s7, [#allocation4]  }
   0xb   :  { %97 = dma.done.wait [#allocation4], 256  }
   0xc   :  { %98 = vsyncadd [#allocation4], 4294967040  ;;  %vm24_vm0 = vcmask 7168   ;;  %v100_v0 = vmov 0.0   ;;  %v26_v1 = vld [vmem:[#allocation3] sm:$0xff]  ;;  %v27_v2 = vld [vmem:[#allocation3 + $0x8] sm:$0xff] }
   0xd   :  { %25 = vst.msk [vmem:[#allocation2] sm:$0xff] %vm24_vm0, %v100_v0  ;;  %v28_v3 = vmax.f32 %v26_v1, 1e-06  ;;  %v29_v4 = vmax.f32 %v27_v2, 1e-06 }
   0xf   :  { %v30_v5 = vmul.f32 %v28_v3, %v28_v3  ;;  %v31_v6 = vmul.f32 %v29_v4, %v29_v4 }
  0x11   :  { %v32_v7 = vmul.f32 %v30_v5, %v28_v3  ;;  %v33_v8 = vmul.f32 %v31_v6, %v29_v4 }
  0x13   :  { %v35_v9 = vadd.f32 %v33_v8, %v32_v7 }
  0x14   :  { %v34_v10 = vld [vmem:[#allocation2] sm:$0xff] }
  0x15   :  { %36 = vadd.xlane.f32.xlu0 %v35_v9 }
  0x9e   :  { %v37_v11 = vpop.xlane.xlu0 %36 }
  0x9f   :  { %v38_v12 = vadd.f32 %v37_v11, %v34_v10 }
  0xa1   :  { %40 = vst.msk [vmem:[#allocation2] sm:$0xff] %vm24_vm0, %v38_v12 }
  0xa8   :  { %v44_v13 = vld [vmem:[#allocation2] sm:$0xff] }
  0xa9   :  { %v45_v14 = vmul.f32 0.00390625, %v44_v13 }
  0xab   :  { %v55_v15 = vand.u32 2147483647, %v45_v14  ;;  %v59_v18 = vand.u32 2147483648, %v45_v14  ;;  %vm54_vm3 = vcmp.lt.f32.partialorder %v45_v14, 0.0  ;;  %vm53_vm4 = vcmp.eq.f32.partialorder %v45_v14, 0.0 }
  0xad   :  { %73 = vlog2.f32 %v55_v15  ;;  %vm63_vm1 = vweird.f32 %v55_v15  ;;  %vm65_vm2 = vcmp.eq.f32.partialorder %v55_v15, 0.0  ;;  %vm56_vm5 = vcmp.eq.f32.partialorder %v55_v15, inf }
  0xba   :  { %v74_v16 = vpop.eup %73 }
  0xbb   :  { %v60_v17 = vmul.f32 0.33333334, %v74_v16 }
  0xbd   :  { %75 = vpow2.f32 %v60_v17 }
  0xca   :  { %v76_v19 = vpop.eup %75 }
  0xcb   :  { %v62_v20 = vor.u32 %v76_v19, %v59_v18 }
  0xcd   :  { %v64_v21 = vsel %vm63_vm1, %v45_v14, %v62_v20 }
  0xce   :  { %v67_v22 = vsel %vm65_vm2, %v59_v18, %v64_v21 }
  0xcf   :  { %v68_v23 = vsel %vm54_vm3, nan, %v67_v22 }
  0xd0   :  { %v69_v24 = vsel %vm53_vm4, 0.0, %v68_v23 }
  0xd1   :  { %v70_v25 = vsel %vm56_vm5, inf, %v69_v24 }
  0xd2   :  { %47 = vst.msk [vmem:[%s121_s1] sm:$0xff] %vm24_vm0, %v70_v25 }
  0xd3   :  { %52 = vsyncpa [#allocation4], 1 }

</bundles_post_ra>
